<compile_context>
chip_gen: v7x
topology: tpu7x:2x2x1
jax: 0.10.0
libtpu: 0.0.40
codegen_flags: <defaults>
</compile_context>

<pallas_src>
import jax
import jax.numpy as jnp
from jax.experimental import pallas as pl
from jax.experimental.pallas import tpu as pltpu

BN_EPS = 1e-5
_VMEM_LIMIT = 48 * 1024 * 1024   # safe on v5e/v6e (128 MiB) and v7x (64 MiB physical)


def _round_up(x, m):
    return (x + m - 1) // m * m


def _pick_tile(n_rows, row_bytes, target_bytes=4 * 1024 * 1024,
               max_tile=1024, granule=16):
    """Row-tile size: multiple of `granule`, <= max_tile, ~target_bytes per block."""
    t = max(granule, min(max_tile, target_bytes // max(int(row_bytes), 1)))
    t = max(granule, (t // granule) * granule)
    return int(min(t, _round_up(n_rows, granule)))


# ---------------------------------------------------------------------------
# Kernel A: sub-pixel matmul  Z = X @ W   (bf16 inputs, f32 accumulate, MXU)
# ---------------------------------------------------------------------------
def _subpixel_matmul_kernel(x_ref, w_ref, z_ref):
    z_ref[...] = jnp.dot(x_ref[...], w_ref[...],
                         preferred_element_type=jnp.float32)


# ---------------------------------------------------------------------------
# Kernel B: per-column sum and sum-of-squares (BN pass 1, reduction over rows)
# ---------------------------------------------------------------------------
def _col_stats_kernel(y_ref, sum_ref, sq_ref):
    @pl.when(pl.program_id(0) == 0)
    def _():
        sum_ref[...] = jnp.zeros_like(sum_ref)
        sq_ref[...] = jnp.zeros_like(sq_ref)
    y = y_ref[...]
    sum_ref[...] += jnp.sum(y, axis=0, keepdims=True)
    sq_ref[...] += jnp.sum(y * y, axis=0, keepdims=True)


# ---------------------------------------------------------------------------
# Kernel C: y * scale + shift, then ReLU (BN pass 2 + activation)
# ---------------------------------------------------------------------------
def _bn_relu_kernel(y_ref, scale_ref, shift_ref, o_ref):
    o_ref[...] = jnp.maximum(
        y_ref[...] * scale_ref[...] + shift_ref[...], 0.0).astype(o_ref.dtype)


# ---------------------------------------------------------------------------
# Wrapper
# ---------------------------------------------------------------------------
def deconv2d_batchnorm_relu(x_nchw, weight, bias, gamma, beta, *,
                            stride, padding, nhwc_out=False):
    """ConvTranspose2d + BatchNorm2d(training batch stats) + ReLU.

    x_nchw: (N, Cin, H, W);  weight: (Cin, Cout, kH, kW) (PyTorch layout).
    `bias` is accepted for interface parity but not used: a per-channel bias
    added before a train-mode BatchNorm is exactly cancelled by the mean
    subtraction, so it never affects the forward output.
    """
    del bias
    N, Cin, H, W = map(int, x_nchw.shape)
    Cin_w, Cout, kH, kW = map(int, weight.shape)
    assert Cin == Cin_w
    s, p = int(stride), int(padding)
    H_out = (H - 1) * s - 2 * p + kH
    W_out = (W - 1) * s - 2 * p + kW

    # ---- glue: NCHW -> NHWC rows, bf16 for the MXU -------------------------
    x_rows = jnp.transpose(x_nchw, (0, 2, 3, 1)).reshape(N * H * W, Cin)
    x_rows = x_rows.astype(jnp.bfloat16)

    # weight matrix: columns ordered (kh, kw, co); pad width to a 128 multiple
    kkC = kH * kW * Cout
    ncols = _round_up(kkC, 128)
    w_mat = jnp.transpose(weight, (0, 2, 3, 1)).reshape(Cin, kkC)
    w_mat = jnp.pad(w_mat, ((0, 0), (0, ncols - kkC))).astype(jnp.bfloat16)

    # ---- kernel A: Z = X @ W, tiled over rows ------------------------------
    M0 = N * H * W
    tile_m = _pick_tile(M0, Cin * 2 + ncols * 4)
    M_pad = _round_up(M0, tile_m)
    if M_pad != M0:
        x_rows = jnp.pad(x_rows, ((0, M_pad - M0), (0, 0)))

    z = pl.pallas_call(
        _subpixel_matmul_kernel,
        out_shape=jax.ShapeDtypeStruct((M_pad, ncols), jnp.float32),
        grid=(M_pad // tile_m,),
        in_specs=[
            pl.BlockSpec((tile_m, Cin), lambda i: (i, 0)),
            pl.BlockSpec((Cin, ncols), lambda i: (0, 0)),
        ],
        out_specs=pl.BlockSpec((tile_m, ncols), lambda i: (i, 0)),
        compiler_params=pltpu.CompilerParams(
            dimension_semantics=("parallel",),
            vmem_limit_bytes=_VMEM_LIMIT),
    )(x_rows, w_mat)

    # ---- glue: overlap-add (pure data movement, no MXU work) ---------------
    z = z[:M0, :kkC].reshape(N, H, W, kH, kW, Cout)
    if kH == s and kW == s and p == 0:
        # no tap overlap -> exact pixel shuffle
        y = jnp.transpose(z, (0, 1, 3, 2, 4, 5)).reshape(N, H_out, W_out, Cout)
    else:
        Hf = (H - 1) * s + kH
        Wf = (W - 1) * s + kW
        y = jnp.zeros((N, Hf, Wf, Cout), jnp.float32)
        for kh in range(kH):
            for kw in range(kW):
                y = y.at[:, kh:kh + (H - 1) * s + 1:s,
                            kw:kw + (W - 1) * s + 1:s, :].add(z[:, :, :, kh, kw, :])
        y = y[:, p:p + H_out, p:p + W_out, :]
    # TODO(synk): for the k==stride, padding==0 fast path the pixel shuffle could be
    # folded into kernel A's output BlockSpec to save one HBM round trip of Y.

    # ---- BatchNorm (batch stats) + ReLU on lane-dense [rows, W_out*Cout] ----
    L = W_out * Cout
    R0 = N * H_out
    y_flat = y.reshape(R0, L)
    tile_r = _pick_tile(R0, 8 * L)
    R_pad = _round_up(R0, tile_r)
    if R_pad != R0:
        y_flat = jnp.pad(y_flat, ((0, R_pad - R0), (0, 0)))   # zero rows: no effect on sums

    col_sum, col_sq = pl.pallas_call(
        _col_stats_kernel,
        out_shape=(jax.ShapeDtypeStruct((1, L), jnp.float32),
                   jax.ShapeDtypeStruct((1, L), jnp.float32)),
        grid=(R_pad // tile_r,),
        in_specs=[pl.BlockSpec((tile_r, L), lambda i: (i, 0))],
        out_specs=(pl.BlockSpec((1, L), lambda i: (0, 0)),
                   pl.BlockSpec((1, L), lambda i: (0, 0))),
        compiler_params=pltpu.CompilerParams(
            dimension_semantics=("arbitrary",),
            vmem_limit_bytes=_VMEM_LIMIT),
    )(y_flat)

    # tiny per-channel finalize (divides by the TRUE N*H_out*W_out extent)
    count = float(N * H_out * W_out)
    ch_sum = col_sum.reshape(W_out, Cout).sum(axis=0)
    ch_sq = col_sq.reshape(W_out, Cout).sum(axis=0)
    mean = ch_sum / count
    var = jnp.maximum(ch_sq / count - mean * mean, 0.0)   # biased var (PyTorch fwd)
    inv = jax.lax.rsqrt(var + BN_EPS)
    scale_c = gamma.astype(jnp.float32) * inv
    shift_c = beta.astype(jnp.float32) - mean * scale_c
    scale_col = jnp.tile(scale_c, W_out).reshape(1, L)
    shift_col = jnp.tile(shift_c, W_out).reshape(1, L)

    out_flat = pl.pallas_call(
        _bn_relu_kernel,
        out_shape=jax.ShapeDtypeStruct((R_pad, L), jnp.float32),
        grid=(R_pad // tile_r,),
        in_specs=[
            pl.BlockSpec((tile_r, L), lambda i: (i, 0)),
            pl.BlockSpec((1, L), lambda i: (0, 0)),
            pl.BlockSpec((1, L), lambda i: (0, 0)),
        ],
        out_specs=pl.BlockSpec((tile_r, L), lambda i: (i, 0)),
        compiler_params=pltpu.CompilerParams(
            dimension_semantics=("parallel",),
            vmem_limit_bytes=_VMEM_LIMIT),
    )(y_flat, scale_col, shift_col)

    out = out_flat[:R0].reshape(N, H_out, W_out, Cout)
    if nhwc_out:
        return out            # channels-last consumers can skip the exit transpose
    return jnp.transpose(out, (0, 3, 1, 2))


# ---------------------------------------------------------------------------
# Pure-JAX reference (ConvTranspose2d via lhs-dilated conv + BN(train) + ReLU)
# ---------------------------------------------------------------------------
def _reference(x_nchw, weight, bias, gamma, beta, *, stride, padding):
    # Uses the same bf16 rounding of x / weight that the Pallas kernel feeds
    # the MXU, with f32 (HIGHEST) accumulation, so the comparison is tight.
    Cin, Cout, kH, kW = weight.shape
    xb = x_nchw.astype(jnp.bfloat16).astype(jnp.float32)
    wb = weight.astype(jnp.bfloat16).astype(jnp.float32)
    w_conv = jnp.transpose(wb[:, :, ::-1, ::-1], (1, 0, 2, 3))  # (Cout, Cin, kH, kW)
    y = jax.lax.conv_general_dilated(
        xb, w_conv,
        window_strides=(1, 1),
        padding=[(kH - 1 - padding, kH - 1 - padding),
                 (kW - 1 - padding, kW - 1 - padding)],
        lhs_dilation=(stride, stride),
        dimension_numbers=('NCHW', 'OIHW', 'NCHW'),
        precision=jax.lax.Precision.HIGHEST)
    y = y + bias[None, :, None, None]          # cancelled by BN; kept to prove it
    mean = jnp.mean(y, axis=(0, 2, 3), keepdims=True)
    var = jnp.mean((y - mean) ** 2, axis=(0, 2, 3), keepdims=True)
    y = (y - mean) * jax.lax.rsqrt(var + BN_EPS)
    y = y * gamma[None, :, None, None] + beta[None, :, None, None]
    return jnp.maximum(y, 0.0)


if __name__ == "__main__":
    key = jax.random.PRNGKey(0)

    # SegNet-style upsample (k == stride, padding 0) plus one overlapping-taps
    # config to exercise the general overlap-add path.
    configs = [
        dict(N=2, Cin=4, H=16, W=16, Cout=4, k=2, stride=2, padding=0),
        dict(N=2, Cin=4, H=16, W=16, Cout=4, k=3, stride=2, padding=1),
    ]

    for cfg in configs:
        key, kx, kw, kb, kg, kbt = jax.random.split(key, 6)
        N, Cin, H, W = cfg["N"], cfg["Cin"], cfg["H"], cfg["W"]
        Cout, k, stride, padding = cfg["Cout"], cfg["k"], cfg["stride"], cfg["padding"]

        x = jax.random.normal(kx, (N, Cin, H, W), dtype=jnp.float32)
        weight = jax.random.normal(kw, (Cin, Cout, k, k), dtype=jnp.float32) * 0.1
        bias = jax.random.normal(kb, (Cout,), dtype=jnp.float32) * 0.1
        gamma = 1.0 + 0.1 * jax.random.normal(kg, (Cout,), dtype=jnp.float32)
        beta = 0.1 * jax.random.normal(kbt, (Cout,), dtype=jnp.float32)

        out = deconv2d_batchnorm_relu(x, weight, bias, gamma, beta,
                                      stride=stride, padding=padding)
        out = jax.block_until_ready(out)

        H_out = (H - 1) * stride - 2 * padding + k
        W_out = (W - 1) * stride - 2 * padding + k
        assert out.shape == (N, Cout, H_out, W_out)

        ref = _reference(x, weight, bias, gamma, beta, stride=stride, padding=padding)
        assert jnp.allclose(out, ref, atol=1e-3, rtol=1e-3), (
            f"mismatch vs reference for {cfg}: "
            f"max abs err {float(jnp.max(jnp.abs(out - ref))):.3e}")

    print("KERNEL_OK")
</pallas_src>

<mosaic_0001>
module attributes {stable_mosaic.version = 11 : i64} {
  func.func @_subpixel_matmul_kernel(%arg0: i32, %arg1: memref<512x4xbf16, #tpu.memory_space<vmem>>, %arg2: memref<4x128xbf16, #tpu.memory_space<vmem>>, %arg3: memref<512x128xf32, #tpu.memory_space<vmem>>) attributes {dimension_semantics = [#tpu.dimension_semantics<parallel>], iteration_bounds = array<i64: 1>, scalar_prefetch = 0 : i64, scratch_operands = 0 : i64, tpu.core_type = #tpu.core_type<tc>, window_params = [{transform_indices = @transform_0, window_bounds = array<i64: 512, 4>}, {pipeline_mode = #tpu.pipeline_mode<synchronous>, transform_indices = @transform_1, window_bounds = array<i64: 4, 128>}, {transform_indices = @transform_2, window_bounds = array<i64: 512, 128>}]} {
    %c0 = arith.constant 0 : index
    %c0_0 = arith.constant 0 : index
    %0 = vector.load %arg1[%c0, %c0_0] : memref<512x4xbf16, #tpu.memory_space<vmem>>, vector<512x4xbf16>
    %c0_1 = arith.constant 0 : index
    %c0_2 = arith.constant 0 : index
    %1 = vector.load %arg2[%c0_1, %c0_2] : memref<4x128xbf16, #tpu.memory_space<vmem>>, vector<4x128xbf16>
    %cst = arith.constant dense<0.000000e+00> : vector<512x128xf32>
    %2 = tpu.matmul %0, %1, %cst {dimension_numbers = #tpu.dot_dimension_numbers<[1], [0], [0], [1], [0, 0, 1, 1], [], []>} : vector<512x4xbf16>, vector<4x128xbf16>, vector<512x128xf32> -> vector<512x128xf32>
    %c0_3 = arith.constant 0 : index
    %c0_4 = arith.constant 0 : index
    %3 = vector.load %arg3[%c0_3, %c0_4] : memref<512x128xf32, #tpu.memory_space<vmem>>, vector<512x128xf32>
    tpu.vector_store %arg3[%c0_3, %c0_4], %2 {strides = array<i32>} : memref<512x128xf32, #tpu.memory_space<vmem>>, vector<512x128xf32>,
    return
  }
  func.func @transform_0(%arg0: i32) -> (i32, i32) {
    %c0_i32 = arith.constant 0 : i32
    %c0_i32_0 = arith.constant 0 : i32
    return %arg0, %c0_i32 : i32, i32
  }
  func.func @transform_1(%arg0: i32) -> (i32, i32) {
    %c0_i32 = arith.constant 0 : i32
    %c0_i32_0 = arith.constant 0 : i32
    %c0_i32_1 = arith.constant 0 : i32
    return %c0_i32, %c0_i32_0 : i32, i32
  }
  func.func @transform_2(%arg0: i32) -> (i32, i32) {
    %c0_i32 = arith.constant 0 : i32
    %c0_i32_0 = arith.constant 0 : i32
    return %arg0, %c0_i32 : i32, i32
  }
}

</mosaic_0001>

<bundles_post_ra>
// kernel: tpu_custom_call.1
= control target key start
LH: loop header
LB: loop body
LE: loop exit
PB: predicated region body
PF: predicated region fallthrough
CT: control target
= control target key end

     0   :  { %vm335_vm0 = vcmask 1041408   ;;  %vm238_vm1 = vcmask 31744   ;;  %s1095_s0 = inlined_call_operand.vmem [shape: bf16[512,4], index: 0, kind: input, shape index: {}]   ;;  %s1096_s1 = inlined_call_operand.vmem [shape: bf16[4,128], index: 1, kind: input, shape index: {}]   ;;  %s1097_s2 = inlined_call_operand.hbm [shape: f32[512,128], index: 2, kind: output, shape index: {}]  }
   0x1   :  { %v77_v0 = vld [vmem:[%s1096_s1] sm:$0x3]  ;;  %v880_v4 = vld [vmem:[%s1095_s0 + $0x8] sm:$0xff]   ;;  %v882_v6 = vld [vmem:[%s1095_s0 + $0x10] sm:$0xff]  }
   0x2   :  { %v878_v1 = vld [vmem:[%s1095_s0] sm:$0xff]   ;;  %873 = vmatprep.subr.msk.bf16.mxu0 %vm335_vm0, %v77_v0  ;;  %874 = vmatprep.subr.msk.bf16.mxu1 %vm335_vm0, %v77_v0  ;;  %v337_v2 = vsel %vm335_vm0, %v77_v0, 0  ;;  %v881_v5 = vld [vmem:[%s1095_s0 + $0x88] sm:$0xff]   ;;  %v883_v7 = vld [vmem:[%s1095_s0 + $0x90] sm:$0xff]  }
   0x3   :  { %806 = vmatpush3.bf16.msra.mxu0 %v337_v2  ;;  %872 = vmatpush3.bf16.msra.mxu1 %v337_v2  ;;  %v879_v3 = vld [vmem:[%s1095_s0 + $0x80] sm:$0xff]   ;;  %v884_v8 = vld [vmem:[%s1095_s0 + $0x18] sm:$0xff]   ;;  %v888_v12 = vld [vmem:[%s1095_s0 + $0x28] sm:$0xff]  }
   0x4   :  { %807 = vmatprep.mubr.msk.bf16.mxu0 %vm238_vm1, %v878_v1  ;;  %839 = vmatprep.mubr.msk.bf16.mxu1 %vm238_vm1, %v879_v3  ;;  %v885_v9 = vld [vmem:[%s1095_s0 + $0x98] sm:$0xff]   ;;  %v886_v10 = vld [vmem:[%s1095_s0 + $0x20] sm:$0xff]   ;;  %v889_v13 = vld [vmem:[%s1095_s0 + $0xa8] sm:$0xff]  }
   0x5   :  { %v887_v11 = vld [vmem:[%s1095_s0 + $0xa0] sm:$0xff]   ;;  %v890_v14 = vld [vmem:[%s1095_s0 + $0x30] sm:$0xff]   ;;  %v892_v16 = vld [vmem:[%s1095_s0 + $0x38] sm:$0xff]  }
   0x6   :  { %808 = vmatmul.mubr.msk.bf16.vlgmr.msra.gmra.mrb[0].mxu0 %vm238_vm1, %v880_v4  ;;  %840 = vmatmul.mubr.msk.bf16.vlgmr.msra.gmra.mrb[0].mxu1 %vm238_vm1, %v881_v5  ;;  %v891_v15 = vld [vmem:[%s1095_s0 + $0xb0] sm:$0xff]   ;;  %v893_v17 = vld [vmem:[%s1095_s0 + $0xb8] sm:$0xff]   ;;  %v894_v18 = vld [vmem:[%s1095_s0 + $0x40] sm:$0xff]  }
   0x7   :  { %811 = vmatprep.mubr.msk.bf16.mxu0 %vm238_vm1, %v882_v6  ;;  %843 = vmatprep.mubr.msk.bf16.mxu1 %vm238_vm1, %v883_v7  ;;  %v895_v19 = vld [vmem:[%s1095_s0 + $0xc0] sm:$0xff]  }
   0xe   :  { %812 = vmatmul.mubr.msk.bf16.gmra.mrb[4].mxu0 %vm238_vm1, %v884_v8  ;;  %844 = vmatmul.mubr.msk.bf16.gmra.mrb[4].mxu1 %vm238_vm1, %v885_v9 }
   0xf   :  { %815 = vmatprep.mubr.msk.bf16.mxu0 %vm238_vm1, %v886_v10  ;;  %847 = vmatprep.mubr.msk.bf16.mxu1 %vm238_vm1, %v887_v11 }
  0x16   :  { %816 = vmatmul.mubr.msk.bf16.gmra.mrb[8].mxu0 %vm238_vm1, %v888_v12  ;;  %848 = vmatmul.mubr.msk.bf16.gmra.mrb[8].mxu1 %vm238_vm1, %v889_v13 }
  0x17   :  { %819 = vmatprep.mubr.msk.bf16.mxu0 %vm238_vm1, %v890_v14  ;;  %851 = vmatprep.mubr.msk.bf16.mxu1 %vm238_vm1, %v891_v15 }
  0x1e   :  { %820 = vmatmul.mubr.msk.bf16.gmra.mrb[12].mxu0 %vm238_vm1, %v892_v16  ;;  %852 = vmatmul.mubr.msk.bf16.gmra.mrb[12].mxu1 %vm238_vm1, %v893_v17 }
  0x1f   :  { %823 = vmatprep.mubr.msk.bf16.mxu0 %vm238_vm1, %v894_v18  ;;  %855 = vmatprep.mubr.msk.bf16.mxu1 %vm238_vm1, %v895_v19 }
  0x20   :  { %7 = vsyncpa [#allocation3], 0  ;;  %v896_v20 = vld [vmem:[%s1095_s0 + $0x48] sm:$0xff]   ;;  %v898_v22 = vld [vmem:[%s1095_s0 + $0x50] sm:$0xff]  }
  0x21   :  { %v897_v21 = vld [vmem:[%s1095_s0 + $0xc8] sm:$0xff]   ;;  %v899_v23 = vld [vmem:[%s1095_s0 + $0xd0] sm:$0xff]   ;;  %v900_v24 = vld [vmem:[%s1095_s0 + $0x58] sm:$0xff]  }
  0x22   :  { %v901_v25 = vld [vmem:[%s1095_s0 + $0xd8] sm:$0xff]   ;;  %v902_v26 = vld [vmem:[%s1095_s0 + $0x60] sm:$0xff]   ;;  %v904_v28 = vld [vmem:[%s1095_s0 + $0x68] sm:$0xff]  }
  0x23   :  { %v903_v27 = vld [vmem:[%s1095_s0 + $0xe0] sm:$0xff]   ;;  %v905_v29 = vld [vmem:[%s1095_s0 + $0xe8] sm:$0xff]   ;;  %v906_v30 = vld [vmem:[%s1095_s0 + $0x70] sm:$0xff]  }
  0x24   :  { %v907_v31 = vld [vmem:[%s1095_s0 + $0xf0] sm:$0xff]   ;;  %v908_v32 = vld [vmem:[%s1095_s0 + $0x78] sm:$0xff]  }
  0x25   :  { %v909_v33 = vld [vmem:[%s1095_s0 + $0xf8] sm:$0xff]   ;;  %s934_s0 = smov [#allocation2]  }
  0x26   :  { %824 = vmatmul.mubr.msk.bf16.gmra.mrb[16].mxu0 %vm238_vm1, %v896_v20  ;;  %856 = vmatmul.mubr.msk.bf16.gmra.mrb[16].mxu1 %vm238_vm1, %v897_v21  ;;  %s697_s1 = sshll.u32 %s934_s0, 4  ;;  %s698_s1 = int_to_ptr.vmem [resolvable:$true] %s697_s1 }
  0x27   :  { %827 = vmatprep.mubr.msk.bf16.mxu0 %vm238_vm1, %v898_v22  ;;  %859 = vmatprep.mubr.msk.bf16.mxu1 %vm238_vm1, %v899_v23  ;;  %s910_s17 = scalar_lea.vmem %s698_s1, 8192  ;;  %p915_p1 = scmp.lt.s32.totalorder %s698_s1, %s698_s1 }
  0x28   :  { %p911_p0 = scmp.ne.s32.totalorder %s698_s1, %s910_s17  ;;  %p916_p2 = scmp.lt.s32.totalorder %s910_s17, %s910_s17 }
  0x2a   :  { %p917_p3 = por %p916_p2, %p915_p1 }
  0x2c   :  { %p918_p4 = pnand %p917_p3, %p911_p0 }
  0x2e   :  { %828 = vmatmul.mubr.msk.bf16.gmra.mrb[20].mxu0 %vm238_vm1, %v900_v24  ;;  %860 = vmatmul.mubr.msk.bf16.gmra.mrb[20].mxu1 %vm238_vm1, %v901_v25 }
  0x2f   :  { %831 = vmatprep.mubr.msk.bf16.mxu0 %vm238_vm1, %v902_v26  ;;  %863 = vmatprep.mubr.msk.bf16.mxu1 %vm238_vm1, %v903_v27 }
  0x36   :  { %832 = vmatmul.mubr.msk.bf16.gmra.mrb[24].mxu0 %vm238_vm1, %v904_v28  ;;  %864 = vmatmul.mubr.msk.bf16.gmra.mrb[24].mxu1 %vm238_vm1, %v905_v29 }
  0x37   :  { %835 = vmatprep.mubr.msk.bf16.mxu0 %vm238_vm1, %v906_v30  ;;  %867 = vmatprep.mubr.msk.bf16.mxu1 %vm238_vm1, %v907_v31 }
  0x3e   :  { %836 = vmatmul.mubr.msk.bf16.gmra.mrb[28].mxu0 %vm238_vm1, %v908_v32  ;;  %868 = vmatmul.mubr.msk.bf16.gmra.mrb[28].mxu1 %vm238_vm1, %v909_v33 }
  0xd9   :  { %v809_v34 = vpop.f32.mrb[0].mxu0  ;;  %v841_v35 = vpop.f32.mrb[0].mxu1 }
  0xda   :  { %630 = vst [vmem:[#allocation2 + $0x10] sm:$0xff] %v809_v34  ;;  %v373_v36 = vpop.f32.mrb[1].mxu0  ;;  %662 = vst [vmem:[#allocation2 + $0x110] sm:$0xff] %v841_v35  ;;  %v501_v37 = vpop.f32.mrb[1].mxu1 }
  0xdb   :  { %628 = vst [vmem:[#allocation2] sm:$0xff] %v373_v36  ;;  %v810_v38 = vpop.f32.mrb[2].mxu0  ;;  %660 = vst [vmem:[#allocation2 + $0x100] sm:$0xff] %v501_v37  ;;  %v842_v39 = vpop.f32.mrb[2].mxu1 }
  0xdc   :  { %631 = vst [vmem:[#allocation2 + $0x18] sm:$0xff] %v810_v38  ;;  %v376_v40 = vpop.f32.mrb[3].mxu0  ;;  %663 = vst [vmem:[#allocation2 + $0x118] sm:$0xff] %v842_v39  ;;  %v504_v41 = vpop.f32.mrb[3].mxu1 }
  0xdd   :  { %629 = vst [vmem:[#allocation2 + $0x8] sm:$0xff] %v376_v40  ;;  %661 = vst [vmem:[#allocation2 + $0x108] sm:$0xff] %v504_v41 }
  0xe1   :  { %v813_v42 = vpop.f32.mrb[4].mxu0  ;;  %v845_v43 = vpop.f32.mrb[4].mxu1 }
  0xe2   :  { %634 = vst [vmem:[#allocation2 + $0x30] sm:$0xff] %v813_v42  ;;  %v389_v44 = vpop.f32.mrb[5].mxu0  ;;  %666 = vst [vmem:[#allocation2 + $0x130] sm:$0xff] %v845_v43  ;;  %v517_v45 = vpop.f32.mrb[5].mxu1 }
  0xe3   :  { %632 = vst [vmem:[#allocation2 + $0x20] sm:$0xff] %v389_v44  ;;  %v814_v46 = vpop.f32.mrb[6].mxu0  ;;  %664 = vst [vmem:[#allocation2 + $0x120] sm:$0xff] %v517_v45  ;;  %v846_v47 = vpop.f32.mrb[6].mxu1 }
  0xe4   :  { %635 = vst [vmem:[#allocation2 + $0x38] sm:$0xff] %v814_v46  ;;  %v392_v48 = vpop.f32.mrb[7].mxu0  ;;  %667 = vst [vmem:[#allocation2 + $0x138] sm:$0xff] %v846_v47  ;;  %v520_v49 = vpop.f32.mrb[7].mxu1 }
  0xe5   :  { %633 = vst [vmem:[#allocation2 + $0x28] sm:$0xff] %v392_v48  ;;  %665 = vst [vmem:[#allocation2 + $0x128] sm:$0xff] %v520_v49 }
  0xe9   :  { %v817_v50 = vpop.f32.mrb[8].mxu0  ;;  %v849_v51 = vpop.f32.mrb[8].mxu1 }
  0xea   :  { %638 = vst [vmem:[#allocation2 + $0x50] sm:$0xff] %v817_v50  ;;  %v405_v52 = vpop.f32.mrb[9].mxu0  ;;  %670 = vst [vmem:[#allocation2 + $0x150] sm:$0xff] %v849_v51  ;;  %v533_v53 = vpop.f32.mrb[9].mxu1 }
  0xeb   :  { %636 = vst [vmem:[#allocation2 + $0x40] sm:$0xff] %v405_v52  ;;  %v818_v54 = vpop.f32.mrb[10].mxu0  ;;  %668 = vst [vmem:[#allocation2 + $0x140] sm:$0xff] %v533_v53  ;;  %v850_v55 = vpop.f32.mrb[10].mxu1 }
  0xec   :  { %639 = vst [vmem:[#allocation2 + $0x58] sm:$0xff] %v818_v54  ;;  %v408_v56 = vpop.f32.mrb[11].mxu0  ;;  %671 = vst [vmem:[#allocation2 + $0x158] sm:$0xff] %v850_v55  ;;  %v536_v57 = vpop.f32.mrb[11].mxu1 }
  0xed   :  { %637 = vst [vmem:[#allocation2 + $0x48] sm:$0xff] %v408_v56  ;;  %669 = vst [vmem:[#allocation2 + $0x148] sm:$0xff] %v536_v57 }
  0xf1   :  { %v821_v58 = vpop.f32.mrb[12].mxu0  ;;  %v853_v59 = vpop.f32.mrb[12].mxu1 }
  0xf2   :  { %642 = vst [vmem:[#allocation2 + $0x70] sm:$0xff] %v821_v58  ;;  %v421_v60 = vpop.f32.mrb[13].mxu0  ;;  %674 = vst [vmem:[#allocation2 + $0x170] sm:$0xff] %v853_v59  ;;  %v549_v61 = vpop.f32.mrb[13].mxu1 }
  0xf3   :  { %640 = vst [vmem:[#allocation2 + $0x60] sm:$0xff] %v421_v60  ;;  %v822_v62 = vpop.f32.mrb[14].mxu0  ;;  %672 = vst [vmem:[#allocation2 + $0x160] sm:$0xff] %v549_v61  ;;  %v854_v63 = vpop.f32.mrb[14].mxu1 }
  0xf4   :  { %643 = vst [vmem:[#allocation2 + $0x78] sm:$0xff] %v822_v62  ;;  %v424_v0 = vpop.f32.mrb[15].mxu0  ;;  %675 = vst [vmem:[#allocation2 + $0x178] sm:$0xff] %v854_v63  ;;  %v552_v1 = vpop.f32.mrb[15].mxu1 }
  0xf5   :  { %641 = vst [vmem:[#allocation2 + $0x68] sm:$0xff] %v424_v0  ;;  %673 = vst [vmem:[#allocation2 + $0x168] sm:$0xff] %v552_v1 }
  0xf9   :  { %v825_v2 = vpop.f32.mrb[16].mxu0  ;;  %v857_v3 = vpop.f32.mrb[16].mxu1 }
  0xfa   :  { %646 = vst [vmem:[#allocation2 + $0x90] sm:$0xff] %v825_v2  ;;  %v437_v4 = vpop.f32.mrb[17].mxu0  ;;  %678 = vst [vmem:[#allocation2 + $0x190] sm:$0xff] %v857_v3  ;;  %v565_v5 = vpop.f32.mrb[17].mxu1 }
  0xfb   :  { %644 = vst [vmem:[#allocation2 + $0x80] sm:$0xff] %v437_v4  ;;  %v826_v6 = vpop.f32.mrb[18].mxu0  ;;  %676 = vst [vmem:[#allocation2 + $0x180] sm:$0xff] %v565_v5  ;;  %v858_v7 = vpop.f32.mrb[18].mxu1 }
  0xfc   :  { %647 = vst [vmem:[#allocation2 + $0x98] sm:$0xff] %v826_v6  ;;  %v440_v8 = vpop.f32.mrb[19].mxu0  ;;  %679 = vst [vmem:[#allocation2 + $0x198] sm:$0xff] %v858_v7  ;;  %v568_v9 = vpop.f32.mrb[19].mxu1 }
  0xfd   :  { %645 = vst [vmem:[#allocation2 + $0x88] sm:$0xff] %v440_v8  ;;  %677 = vst [vmem:[#allocation2 + $0x188] sm:$0xff] %v568_v9 }
 0x101   :  { %v829_v10 = vpop.f32.mrb[20].mxu0  ;;  %v861_v11 = vpop.f32.mrb[20].mxu1 }
 0x102   :  { %650 = vst [vmem:[#allocation2 + $0xb0] sm:$0xff] %v829_v10  ;;  %v453_v12 = vpop.f32.mrb[21].mxu0  ;;  %682 = vst [vmem:[#allocation2 + $0x1b0] sm:$0xff] %v861_v11  ;;  %v581_v13 = vpop.f32.mrb[21].mxu1 }
 0x103   :  { %648 = vst [vmem:[#allocation2 + $0xa0] sm:$0xff] %v453_v12  ;;  %v830_v14 = vpop.f32.mrb[22].mxu0  ;;  %680 = vst [vmem:[#allocation2 + $0x1a0] sm:$0xff] %v581_v13  ;;  %v862_v15 = vpop.f32.mrb[22].mxu1 }
 0x104   :  { %651 = vst [vmem:[#allocation2 + $0xb8] sm:$0xff] %v830_v14  ;;  %v456_v16 = vpop.f32.mrb[23].mxu0  ;;  %683 = vst [vmem:[#allocation2 + $0x1b8] sm:$0xff] %v862_v15  ;;  %v584_v17 = vpop.f32.mrb[23].mxu1 }
 0x105   :  { %649 = vst [vmem:[#allocation2 + $0xa8] sm:$0xff] %v456_v16  ;;  %681 = vst [vmem:[#allocation2 + $0x1a8] sm:$0xff] %v584_v17 }
 0x109   :  { %v833_v18 = vpop.f32.mrb[24].mxu0  ;;  %v865_v19 = vpop.f32.mrb[24].mxu1 }
 0x10a   :  { %654 = vst [vmem:[#allocation2 + $0xd0] sm:$0xff] %v833_v18  ;;  %v469_v20 = vpop.f32.mrb[25].mxu0  ;;  %686 = vst [vmem:[#allocation2 + $0x1d0] sm:$0xff] %v865_v19  ;;  %v597_v21 = vpop.f32.mrb[25].mxu1 }
 0x10b   :  { %652 = vst [vmem:[#allocation2 + $0xc0] sm:$0xff] %v469_v20  ;;  %v834_v22 = vpop.f32.mrb[26].mxu0  ;;  %684 = vst [vmem:[#allocation2 + $0x1c0] sm:$0xff] %v597_v21  ;;  %v866_v23 = vpop.f32.mrb[26].mxu1 }
 0x10c   :  { %655 = vst [vmem:[#allocation2 + $0xd8] sm:$0xff] %v834_v22  ;;  %v472_v24 = vpop.f32.mrb[27].mxu0  ;;  %687 = vst [vmem:[#allocation2 + $0x1d8] sm:$0xff] %v866_v23  ;;  %v600_v25 = vpop.f32.mrb[27].mxu1 }
 0x10d   :  { %653 = vst [vmem:[#allocation2 + $0xc8] sm:$0xff] %v472_v24  ;;  %685 = vst [vmem:[#allocation2 + $0x1c8] sm:$0xff] %v600_v25 }
 0x111   :  { %v837_v26 = vpop.f32.mrb[28].mxu0  ;;  %v869_v27 = vpop.f32.mrb[28].mxu1 }
 0x112   :  { %658 = vst [vmem:[#allocation2 + $0xf0] sm:$0xff] %v837_v26  ;;  %v485_v28 = vpop.f32.mrb[29].mxu0  ;;  %690 = vst [vmem:[#allocation2 + $0x1f0] sm:$0xff] %v869_v27  ;;  %v613_v29 = vpop.f32.mrb[29].mxu1 }
 0x113   :  { %656 = vst [vmem:[#allocation2 + $0xe0] sm:$0xff] %v485_v28  ;;  %v838_v30 = vpop.f32.mrb[30].mxu0  ;;  %688 = vst [vmem:[#allocation2 + $0x1e0] sm:$0xff] %v613_v29  ;;  %v870_v31 = vpop.f32.mrb[30].mxu1 }
 0x114   :  { %659 = vst [vmem:[#allocation2 + $0xf8] sm:$0xff] %v838_v30  ;;  %v488_v32 = vpop.f32.mrb[31].mxu0  ;;  %691 = vst [vmem:[#allocation2 + $0x1f8] sm:$0xff] %v870_v31  ;;  %v616_v33 = vpop.f32.mrb[31].mxu1 }
 0x115   :  { %657 = vst [vmem:[#allocation2 + $0xe8] sm:$0xff] %v488_v32  ;;  %689 = vst [vmem:[#allocation2 + $0x1e8] sm:$0xff] %v616_v33 }
 0x116   :  { %921 = shalt.err (!%p918_p4)
}
 0x117   :  { %s922_s20 = scalar_lea.hbm %s1097_s2, 8192 }
 0x118   :  { %p923_p5 = scmp.ne.s32.totalorder %s1097_s2, %s922_s20  ;;  %p926_p6 = scmp.lt.u32.totalorder %s922_s20, %s1097_s2 }
 0x11a   :  { %p928_p7 = pnand %p926_p6, %p923_p5 }
 0x11c   :  { %931 = shalt.err (!%p928_p7)
}
 0x11d   :  { %s935_s25 = smov 128   ;;  %s936_s26 = smov 8  }
 0x11e   :  { %703 = dma.vmem_to_hbm [thread:$0]  %s698_s1, 8192, %s1097_s2, [#allocation3], %s935_s25, %s935_s25, %s936_s26  }
 0x11f   :  { %932 = dma.done.wait [#allocation3], 8192  }
 0x120   :  { %933 = vsyncadd [#allocation3], 4294959104 }
 0x121   :  { %707 = vsyncpa [#allocation3], 1 }

</bundles_post_ra>
